<compile_context>
chip_gen: v7x
topology: tpu7x:2x2x1
jax: 0.10.0
libtpu: 0.0.40
codegen_flags: <defaults>
</compile_context>

<pallas_src>
import functools

import jax
import jax.numpy as jnp
from jax.experimental import pallas as pl
from jax.experimental.pallas import tpu as pltpu

BN_EPS = 1e-5
NEG_BIG = -1e30           # drives padded softmax columns to exactly 0
H1 = 256
H2 = 64
H2_PAD = 128              # hidden dim 64 zero-padded to a full lane width
VMEM_LIMIT_BYTES = 48 * 1024 * 1024   # safe on v5e/v6e (128 MiB) and v7x (64 MiB)


def _round_up(x, m):
    return (x + m - 1) // m * m


def _mlp_kernel(x_ref,
                w1_ref, b1_ref,
                w2_ref, b2_ref,
                w3_ref, b3_ref, s3_ref, t3_ref,
                o_ref):
    # x arrives as bf16 (half the HBM traffic of f32); MXU matmuls run with
    # bf16 operands and f32 accumulation.
    x = x_ref[...]

    # layer1: Linear(D_in, 256) -> ReLU        (BN1 folded into layer2 weights)
    h = jnp.dot(x, w1_ref[...], preferred_element_type=jnp.float32) + b1_ref[...]
    h = jnp.maximum(h, 0.0)

    # layer2: Linear(256, 128-padded) -> ReLU  (BN2 folded into layer3 weights)
    h = jnp.dot(h.astype(jnp.bfloat16), w2_ref[...],
                preferred_element_type=jnp.float32) + b2_ref[...]
    h = jnp.maximum(h, 0.0)

    # output: Linear(128-padded, D_pad) -> ReLU -> BN3 affine -> Softmax
    h = jnp.dot(h.astype(jnp.bfloat16), w3_ref[...],
                preferred_element_type=jnp.float32) + b3_ref[...]
    h = jnp.maximum(h, 0.0)
    h = h * s3_ref[...] + t3_ref[...]          # padded columns -> NEG_BIG

    z = h - jnp.max(h, axis=1, keepdims=True)
    e = jnp.exp(z)                             # padded columns -> exactly 0
    inv = pl.reciprocal(jnp.sum(e, axis=1, keepdims=True), approx=True)
    o_ref[...] = (e * inv).astype(o_ref.dtype)


def prepare_params(params):
    """One-time parameter glue (call once, reuse on every forward call).

    Transposes weights, folds BN1/BN2 into the next layer and BN3 into a
    pre-softmax affine, zero-pads H2 64->128 and D_out up to a multiple of
    128, and casts matmul weights to bf16.
    """
    D_out = params["w3"].shape[0]
    D_pad = _round_up(D_out, 128)

    def fold_bn(gamma, beta, mean, var):
        scale = gamma / jnp.sqrt(var + BN_EPS)
        shift = beta - mean * scale
        return scale, shift

    w1_t = params["w1"].T                         # (D_in, 256)
    w2_t = params["w2"].T                         # (256, 64)
    w3_t = params["w3"].T                         # (64, D_out)
    s1, t1 = fold_bn(params["bn1_gamma"], params["bn1_beta"],
                     params["bn1_mean"], params["bn1_var"])
    s2, t2 = fold_bn(params["bn2_gamma"], params["bn2_beta"],
                     params["bn2_mean"], params["bn2_var"])
    s3, t3 = fold_bn(params["bn3_gamma"], params["bn3_beta"],
                     params["bn3_mean"], params["bn3_var"])

    # Fold BN1 into layer2 and BN2 into layer3 (eval-mode BN is affine).
    w2_eff = s1[:, None] * w2_t                   # (256, 64)
    b2_eff = params["b2"] + t1 @ w2_t             # (64,)
    w3_eff = s2[:, None] * w3_t                   # (64, D_out)
    b3_eff = params["b3"] + t2 @ w3_t             # (D_out,)

    # Zero-pad H2 64 -> 128 (exact: padded layer-2 columns give ReLU(0)=0 and
    # the matching layer-3 rows are zero).
    w2_eff = jnp.pad(w2_eff, ((0, 0), (0, H2_PAD - H2)))
    b2_eff = jnp.pad(b2_eff, ((0, H2_PAD - H2),))
    w3_eff = jnp.pad(w3_eff, ((0, H2_PAD - H2), (0, 0)))

    # Zero-pad D_out to a lane-dense multiple of 128.  The three pads below
    # work together: padded w3 columns / b3 entries / s3 entries are 0, so the
    # pre-affine value is 0 there, and padded t3 = NEG_BIG drives exp() to
    # exactly 0 -> padded softmax columns contribute nothing.
    pad = D_pad - D_out
    w3_eff = jnp.pad(w3_eff, ((0, 0), (0, pad)))
    b3_eff = jnp.pad(b3_eff, ((0, pad),))
    s3 = jnp.pad(s3, ((0, pad),))
    t3 = jnp.pad(t3, ((0, pad),), constant_values=NEG_BIG)

    return {
        "tensors": {
            "w1": w1_t.astype(jnp.bfloat16),
            "b1": params["b1"][None, :].astype(jnp.float32),
            "w2": w2_eff.astype(jnp.bfloat16),
            "b2": b2_eff[None, :].astype(jnp.float32),
            "w3": w3_eff.astype(jnp.bfloat16),
            "b3": b3_eff[None, :].astype(jnp.float32),
            "s3": s3[None, :].astype(jnp.float32),
            "t3": t3[None, :].astype(jnp.float32),
        },
        "d_out": int(D_out),
    }


@functools.partial(jax.jit, static_argnames=("d_out", "batch_tile"))
def _forward_jit(x, t, *, d_out, batch_tile):
    N, D_in = x.shape
    D_pad = t["w3"].shape[1]

    # The kernel is HBM-bound on the x DMA: producers should hand us bf16
    # directly; the fallback cast below only runs (fused under jit) if not.
    if x.dtype != jnp.bfloat16:
        x = x.astype(jnp.bfloat16)

    # Batch tiling: pipelined x DMA; for N >= 16 guarantee >= 2 grid steps so
    # the "parallel" axis shards across both TensorCores on v7x.
    if batch_tile is None:
        if N >= 16:
            batch_tile = min(2048, _round_up((N + 1) // 2, 8))
        else:
            batch_tile = _round_up(N, 8)
    batch_tile = max(8, _round_up(batch_tile, 8))
    N_pad = _round_up(N, batch_tile)
    if N_pad != N:
        x = jnp.pad(x, ((0, N_pad - N), (0, 0)))

    def const_spec(shape):
        # Constant block index -> Pallas keeps these resident across grid
        # steps (no re-DMA).
        return pl.BlockSpec(shape, lambda i: (0, 0))

    out = pl.pallas_call(
        _mlp_kernel,
        out_shape=jax.ShapeDtypeStruct((N_pad, D_pad), jnp.bfloat16),
        grid_spec=pltpu.PrefetchScalarGridSpec(
            num_scalar_prefetch=0,
            grid=(N_pad // batch_tile,),
            in_specs=[
                pl.BlockSpec((batch_tile, D_in), lambda i: (i, 0)),
                const_spec((D_in, H1)), const_spec((1, H1)),
                const_spec((H1, H2_PAD)), const_spec((1, H2_PAD)),
                const_spec((H2_PAD, D_pad)), const_spec((1, D_pad)),
                const_spec((1, D_pad)), const_spec((1, D_pad)),
            ],
            out_specs=pl.BlockSpec((batch_tile, D_pad), lambda i: (i, 0)),
        ),
        compiler_params=pltpu.CompilerParams(
            dimension_semantics=("parallel",),
            vmem_limit_bytes=VMEM_LIMIT_BYTES),
    )(x, t["w1"], t["b1"], t["w2"], t["b2"], t["w3"], t["b3"], t["s3"], t["t3"])
    return out[:N, :d_out]


def mnist_classifier_forward(x, prepared, *, batch_tile=None):
    """x: (N, D_in), ideally bfloat16.  prepared: output of prepare_params."""
    return _forward_jit(x, prepared["tensors"],
                        d_out=prepared["d_out"], batch_tile=batch_tile)


def init_params(key, D_in, D_out):
    """Deterministic synthetic parameters matching MnistClassifier.__init__ shapes."""
    ks = jax.random.split(key, 12)

    def linear(kw, kb, fan_in, fan_out):
        bound = 1.0 / jnp.sqrt(fan_in)
        w = jax.random.uniform(kw, (fan_out, fan_in), jnp.float32, -bound, bound)
        b = jax.random.uniform(kb, (fan_out,), jnp.float32, -bound, bound)
        return w, b

    w1, b1 = linear(ks[0], ks[1], D_in, H1)
    w2, b2 = linear(ks[2], ks[3], H1, H2)
    w3, b3 = linear(ks[4], ks[5], H2, D_out)

    def bn(kmean, kvar, h):
        gamma = jnp.ones((h,), jnp.float32)
        beta = jnp.zeros((h,), jnp.float32)
        mean = 0.1 * jax.random.normal(kmean, (h,), jnp.float32)
        var = 1.0 + 0.1 * jax.random.uniform(kvar, (h,), jnp.float32)
        return gamma, beta, mean, var

    bn1 = bn(ks[6], ks[7], H1)
    bn2 = bn(ks[8], ks[9], H2)
    bn3 = bn(ks[10], ks[11], D_out)

    return {
        "w1": w1, "b1": b1,
        "w2": w2, "b2": b2,
        "w3": w3, "b3": b3,
        "bn1_gamma": bn1[0], "bn1_beta": bn1[1], "bn1_mean": bn1[2], "bn1_var": bn1[3],
        "bn2_gamma": bn2[0], "bn2_beta": bn2[1], "bn2_mean": bn2[2], "bn2_var": bn2[3],
        "bn3_gamma": bn3[0], "bn3_beta": bn3[1], "bn3_mean": bn3[2], "bn3_var": bn3[3],
    }


def reference_forward(x, p):
    """Pure-JAX f32 reference (eval-mode BatchNorm), for correctness checks."""
    def bn(h, g, b, m, v):
        return g * (h - m) / jnp.sqrt(v + BN_EPS) + b

    h = jnp.maximum(x @ p["w1"].T + p["b1"], 0.0)
    h = bn(h, p["bn1_gamma"], p["bn1_beta"], p["bn1_mean"], p["bn1_var"])
    h = jnp.maximum(h @ p["w2"].T + p["b2"], 0.0)
    h = bn(h, p["bn2_gamma"], p["bn2_beta"], p["bn2_mean"], p["bn2_var"])
    h = jnp.maximum(h @ p["w3"].T + p["b3"], 0.0)
    h = bn(h, p["bn3_gamma"], p["bn3_beta"], p["bn3_mean"], p["bn3_var"])
    return jax.nn.softmax(h, axis=1)


if __name__ == "__main__":
    # Small shapes consistent with the module: x is (batch, D_in).
    N, D_in, D_out = 8, 128, 10
    key = jax.random.PRNGKey(0)
    k_param, k_x, k_x2, k_x3 = jax.random.split(key, 4)

    params = init_params(k_param, D_in, D_out)
    prepared = prepare_params(params)   # one-time fold/pad/bf16-cast

    # 1) Tiny batch; producer hands the kernel bf16 activations.
    x = jax.random.normal(k_x, (N, D_in), jnp.float32)
    out = jax.block_until_ready(
        mnist_classifier_forward(x.astype(jnp.bfloat16), prepared))
    ref = reference_forward(x, params)
    out32 = out.astype(jnp.float32)
    assert out.shape == (N, D_out) and out.dtype == jnp.bfloat16
    # bf16 inputs/weights/outputs + approx reciprocal -> looser tolerance.
    assert jnp.allclose(out32, ref, atol=3e-2), float(jnp.max(jnp.abs(out32 - ref)))
    assert jnp.allclose(jnp.sum(out32, axis=1), 1.0, atol=1e-2)

    # 2) Ragged batch + explicit small tile: multi-step pipelined grid.
    N2 = 200
    x2 = jax.random.normal(k_x2, (N2, D_in), jnp.float32)
    out2 = jax.block_until_ready(
        mnist_classifier_forward(x2.astype(jnp.bfloat16), prepared, batch_tile=64))
    ref2 = reference_forward(x2, params)
    out2_32 = out2.astype(jnp.float32)
    assert out2.shape == (N2, D_out)
    assert jnp.allclose(out2_32, ref2, atol=3e-2)
    assert jnp.allclose(jnp.sum(out2_32, axis=1), 1.0, atol=1e-2)

    # 3) Default tile path: N >= 16 -> at least 2 grid steps (v7x megacore).
    N3 = 256
    x3 = jax.random.normal(k_x3, (N3, D_in), jnp.float32)
    out3 = jax.block_until_ready(
        mnist_classifier_forward(x3.astype(jnp.bfloat16), prepared))
    ref3 = reference_forward(x3, params)
    assert out3.shape == (N3, D_out)
    assert jnp.allclose(out3.astype(jnp.float32), ref3, atol=3e-2)

    print("KERNEL_OK")
</pallas_src>

<mosaic_0001>
module attributes {stable_mosaic.version = 11 : i64} {
  func.func @_mlp_kernel(%arg0: i32, %arg1: memref<8x128xbf16, #tpu.memory_space<vmem>>, %arg2: memref<128x256xbf16, #tpu.memory_space<vmem>>, %arg3: memref<1x256xf32, #tpu.memory_space<vmem>>, %arg4: memref<256x128xbf16, #tpu.memory_space<vmem>>, %arg5: memref<1x128xf32, #tpu.memory_space<vmem>>, %arg6: memref<128x128xbf16, #tpu.memory_space<vmem>>, %arg7: memref<1x128xf32, #tpu.memory_space<vmem>>, %arg8: memref<1x128xf32, #tpu.memory_space<vmem>>, %arg9: memref<1x128xf32, #tpu.memory_space<vmem>>, %arg10: memref<8x128xbf16, #tpu.memory_space<vmem>>) attributes {dimension_semantics = [#tpu.dimension_semantics<parallel>], iteration_bounds = array<i64: 1>, scalar_prefetch = 0 : i64, scratch_operands = 0 : i64, tpu.core_type = #tpu.core_type<tc>, window_params = [{transform_indices = @transform_0, window_bounds = array<i64: 8, 128>}, {pipeline_mode = #tpu.pipeline_mode<synchronous>, transform_indices = @transform_1, window_bounds = array<i64: 128, 256>}, {pipeline_mode = #tpu.pipeline_mode<synchronous>, transform_indices = @transform_2, window_bounds = array<i64: 1, 256>}, {pipeline_mode = #tpu.pipeline_mode<synchronous>, transform_indices = @transform_3, window_bounds = array<i64: 256, 128>}, {pipeline_mode = #tpu.pipeline_mode<synchronous>, transform_indices = @transform_4, window_bounds = array<i64: 1, 128>}, {pipeline_mode = #tpu.pipeline_mode<synchronous>, transform_indices = @transform_5, window_bounds = array<i64: 128, 128>}, {pipeline_mode = #tpu.pipeline_mode<synchronous>, transform_indices = @transform_6, window_bounds = array<i64: 1, 128>}, {pipeline_mode = #tpu.pipeline_mode<synchronous>, transform_indices = @transform_7, window_bounds = array<i64: 1, 128>}, {pipeline_mode = #tpu.pipeline_mode<synchronous>, transform_indices = @transform_8, window_bounds = array<i64: 1, 128>}, {transform_indices = @transform_9, window_bounds = array<i64: 8, 128>}]} {
    %c0 = arith.constant 0 : index
    %c0_0 = arith.constant 0 : index
    %0 = vector.load %arg1[%c0, %c0_0] : memref<8x128xbf16, #tpu.memory_space<vmem>>, vector<8x128xbf16>
    %c0_1 = arith.constant 0 : index
    %c0_2 = arith.constant 0 : index
    %1 = vector.load %arg2[%c0_1, %c0_2] : memref<128x256xbf16, #tpu.memory_space<vmem>>, vector<128x256xbf16>
    %cst = arith.constant dense<0.000000e+00> : vector<8x256xf32>
    %2 = tpu.matmul %0, %1, %cst {dimension_numbers = #tpu.dot_dimension_numbers<[1], [0], [0], [1], [0, 0, 1, 1], [], []>} : vector<8x128xbf16>, vector<128x256xbf16>, vector<8x256xf32> -> vector<8x256xf32>
    %c0_3 = arith.constant 0 : index
    %c0_4 = arith.constant 0 : index
    %3 = vector.load %arg3[%c0_3, %c0_4] : memref<1x256xf32, #tpu.memory_space<vmem>>, vector<1x256xf32>
    %4 = vector.broadcast %3 : vector<1x256xf32> to vector<8x256xf32>
    %5 = arith.addf %2, %4 : vector<8x256xf32>
    %cst_5 = arith.constant 0.000000e+00 : f32
    %6 = vector.broadcast %cst_5 : f32 to vector<8x256xf32>
    %7 = arith.maximumf %5, %6 : vector<8x256xf32>
    %8 = arith.truncf %7 : vector<8x256xf32> to vector<8x256xbf16>
    %c0_6 = arith.constant 0 : index
    %c0_7 = arith.constant 0 : index
    %9 = vector.load %arg4[%c0_6, %c0_7] : memref<256x128xbf16, #tpu.memory_space<vmem>>, vector<256x128xbf16>
    %cst_8 = arith.constant dense<0.000000e+00> : vector<8x128xf32>
    %10 = tpu.matmul %8, %9, %cst_8 {dimension_numbers = #tpu.dot_dimension_numbers<[1], [0], [0], [1], [0, 0, 1, 1], [], []>} : vector<8x256xbf16>, vector<256x128xbf16>, vector<8x128xf32> -> vector<8x128xf32>
    %c0_9 = arith.constant 0 : index
    %c0_10 = arith.constant 0 : index
    %11 = vector.load %arg5[%c0_9, %c0_10] : memref<1x128xf32, #tpu.memory_space<vmem>>, vector<1x128xf32>
    %12 = vector.broadcast %11 : vector<1x128xf32> to vector<8x128xf32>
    %13 = arith.addf %10, %12 : vector<8x128xf32>
    %cst_11 = arith.constant 0.000000e+00 : f32
    %14 = vector.broadcast %cst_11 : f32 to vector<8x128xf32>
    %15 = arith.maximumf %13, %14 : vector<8x128xf32>
    %16 = arith.truncf %15 : vector<8x128xf32> to vector<8x128xbf16>
    %c0_12 = arith.constant 0 : index
    %c0_13 = arith.constant 0 : index
    %17 = vector.load %arg6[%c0_12, %c0_13] : memref<128x128xbf16, #tpu.memory_space<vmem>>, vector<128x128xbf16>
    %cst_14 = arith.constant dense<0.000000e+00> : vector<8x128xf32>
    %18 = tpu.matmul %16, %17, %cst_14 {dimension_numbers = #tpu.dot_dimension_numbers<[1], [0], [0], [1], [0, 0, 1, 1], [], []>} : vector<8x128xbf16>, vector<128x128xbf16>, vector<8x128xf32> -> vector<8x128xf32>
    %c0_15 = arith.constant 0 : index
    %c0_16 = arith.constant 0 : index
    %19 = vector.load %arg7[%c0_15, %c0_16] : memref<1x128xf32, #tpu.memory_space<vmem>>, vector<1x128xf32>
    %20 = vector.broadcast %19 : vector<1x128xf32> to vector<8x128xf32>
    %21 = arith.addf %18, %20 : vector<8x128xf32>
    %cst_17 = arith.constant 0.000000e+00 : f32
    %22 = vector.broadcast %cst_17 : f32 to vector<8x128xf32>
    %23 = arith.maximumf %21, %22 : vector<8x128xf32>
    %c0_18 = arith.constant 0 : index
    %c0_19 = arith.constant 0 : index
    %24 = vector.load %arg8[%c0_18, %c0_19] : memref<1x128xf32, #tpu.memory_space<vmem>>, vector<1x128xf32>
    %25 = vector.broadcast %24 : vector<1x128xf32> to vector<8x128xf32>
    %26 = arith.mulf %23, %25 : vector<8x128xf32>
    %c0_20 = arith.constant 0 : index
    %c0_21 = arith.constant 0 : index
    %27 = vector.load %arg9[%c0_20, %c0_21] : memref<1x128xf32, #tpu.memory_space<vmem>>, vector<1x128xf32>
    %28 = vector.broadcast %27 : vector<1x128xf32> to vector<8x128xf32>
    %29 = arith.addf %26, %28 : vector<8x128xf32>
    %cst_22 = arith.constant dense<0xFF800000> : vector<8xf32>
    %30 = vector.multi_reduction <maximumf>, %29, %cst_22 [1] : vector<8x128xf32> to vector<8xf32>
    %31 = vector.shape_cast %30 : vector<8xf32> to vector<8x1xf32>
    %32 = vector.broadcast %31 : vector<8x1xf32> to vector<8x128xf32>
    %33 = arith.subf %29, %32 : vector<8x128xf32>
    %34 = math.exp %33 : vector<8x128xf32>
    %cst_23 = arith.constant dense<0.000000e+00> : vector<8xf32>
    %35 = vector.multi_reduction <add>, %34, %cst_23 [1] : vector<8x128xf32> to vector<8xf32>
    %36 = vector.shape_cast %35 : vector<8xf32> to vector<8x1xf32>
    %37 = tpu.reciprocal %36 {approx = true} : vector<8x1xf32> -> vector<8x1xf32>
    %38 = vector.broadcast %37 : vector<8x1xf32> to vector<8x128xf32>
    %39 = arith.mulf %34, %38 : vector<8x128xf32>
    %40 = arith.truncf %39 : vector<8x128xf32> to vector<8x128xbf16>
    %c0_24 = arith.constant 0 : index
    %c0_25 = arith.constant 0 : index
    %41 = vector.load %arg10[%c0_24, %c0_25] : memref<8x128xbf16, #tpu.memory_space<vmem>>, vector<8x128xbf16>
    tpu.vector_store %arg10[%c0_24, %c0_25], %40 {strides = array<i32>} : memref<8x128xbf16, #tpu.memory_space<vmem>>, vector<8x128xbf16>,
    return
  }
  func.func @transform_0(%arg0: i32) -> (i32, i32) {
    %c0_i32 = arith.constant 0 : i32
    %c0_i32_0 = arith.constant 0 : i32
    return %arg0, %c0_i32 : i32, i32
  }
  func.func @transform_1(%arg0: i32) -> (i32, i32) {
    %c0_i32 = arith.constant 0 : i32
    %c0_i32_0 = arith.constant 0 : i32
    %c0_i32_1 = arith.constant 0 : i32
    return %c0_i32, %c0_i32_0 : i32, i32
  }
  func.func @transform_2(%arg0: i32) -> (i32, i32) {
    %c0_i32 = arith.constant 0 : i32
    %c0_i32_0 = arith.constant 0 : i32
    %c0_i32_1 = arith.constant 0 : i32
    return %c0_i32, %c0_i32_0 : i32, i32
  }
  func.func @transform_3(%arg0: i32) -> (i32, i32) {
    %c0_i32 = arith.constant 0 : i32
    %c0_i32_0 = arith.constant 0 : i32
    %c0_i32_1 = arith.constant 0 : i32
    return %c0_i32, %c0_i32_0 : i32, i32
  }
  func.func @transform_4(%arg0: i32) -> (i32, i32) {
    %c0_i32 = arith.constant 0 : i32
    %c0_i32_0 = arith.constant 0 : i32
    %c0_i32_1 = arith.constant 0 : i32
    return %c0_i32, %c0_i32_0 : i32, i32
  }
  func.func @transform_5(%arg0: i32) -> (i32, i32) {
    %c0_i32 = arith.constant 0 : i32
    %c0_i32_0 = arith.constant 0 : i32
    %c0_i32_1 = arith.constant 0 : i32
    return %c0_i32, %c0_i32_0 : i32, i32
  }
  func.func @transform_6(%arg0: i32) -> (i32, i32) {
    %c0_i32 = arith.constant 0 : i32
    %c0_i32_0 = arith.constant 0 : i32
    %c0_i32_1 = arith.constant 0 : i32
    return %c0_i32, %c0_i32_0 : i32, i32
  }
  func.func @transform_7(%arg0: i32) -> (i32, i32) {
    %c0_i32 = arith.constant 0 : i32
    %c0_i32_0 = arith.constant 0 : i32
    %c0_i32_1 = arith.constant 0 : i32
    return %c0_i32, %c0_i32_0 : i32, i32
  }
  func.func @transform_8(%arg0: i32) -> (i32, i32) {
    %c0_i32 = arith.constant 0 : i32
    %c0_i32_0 = arith.constant 0 : i32
    %c0_i32_1 = arith.constant 0 : i32
    return %c0_i32, %c0_i32_0 : i32, i32
  }
  func.func @transform_9(%arg0: i32) -> (i32, i32) {
    %c0_i32 = arith.constant 0 : i32
    %c0_i32_0 = arith.constant 0 : i32
    return %arg0, %c0_i32 : i32, i32
  }
}

</mosaic_0001>

<bundles_post_ra>
// kernel: _forward_jit.1
= control target key start
LH: loop header
LB: loop body
LE: loop exit
PB: predicated region body
PF: predicated region fallthrough
CT: control target
= control target key end

     0   :  { %14 = vsyncpa [#allocation3], 0  ;;  %s988_s0 = inlined_call_operand.hbm [shape: bf16[8,128], index: 0, kind: input, shape index: {}]   ;;  %s989_s1 = inlined_call_operand.hbm [shape: bf16[128,256], index: 1, kind: input, shape index: {}]   ;;  %s990_s2 = inlined_call_operand.vmem [shape: f32[1,256], index: 2, kind: input, shape index: {}]   ;;  %s991_s3 = inlined_call_operand.hbm [shape: bf16[256,128], index: 3, kind: input, shape index: {}]   ;;  %s992_s4 = inlined_call_operand.vmem [shape: f32[1,128], index: 4, kind: input, shape index: {}]   ;;  %s993_s5 = inlined_call_operand.hbm [shape: bf16[128,128], index: 5, kind: input, shape index: {}]   ;;  %s994_s6 = inlined_call_operand.vmem [shape: f32[1,128], index: 6, kind: input, shape index: {}]   ;;  %s995_s7 = inlined_call_operand.vmem [shape: f32[1,128], index: 7, kind: input, shape index: {}]   ;;  %s996_s8 = inlined_call_operand.vmem [shape: f32[1,128], index: 8, kind: input, shape index: {}]   ;;  %s997_s9 = inlined_call_operand.hbm [shape: bf16[8,128], index: 9, kind: output, shape index: {}]  }
   0x1   :  { %15 = vsyncpa [#allocation6], 0 }
   0x2   :  { %16 = vsyncpa [#allocation9], 0 }
   0x3   :  { %17 = vsyncpa [#allocation4], 0  ;;  %s851_s30 = smov [#allocation5]   ;;  %s733_s13 = scalar_lea.hbm %s989_s1, 2048 }
   0x4   :  { %s33_s10 = sshll.u32 %s851_s30, 4  ;;  %p734_p0 = scmp.ne.s32.totalorder %s989_s1, %s733_s13  ;;  %s34_s10 = int_to_ptr.vmem [resolvable:$true] %s33_s10 }
   0x5   :  { %p737_p1 = scmp.lt.u32.totalorder %s733_s13, %s989_s1 }
   0x7   :  { %p739_p2 = pnand %p737_p1, %p734_p0 }
   0x9   :  { %742 = shalt.err (!%p739_p2)
}
   0xa   :  { %s743_s18 = scalar_lea.vmem %s34_s10, 2048  ;;  %p748_p4 = scmp.lt.s32.totalorder %s34_s10, %s34_s10 }
   0xb   :  { %p744_p3 = scmp.ne.s32.totalorder %s34_s10, %s743_s18  ;;  %p749_p5 = scmp.lt.s32.totalorder %s743_s18, %s743_s18 }
   0xd   :  { %p750_p6 = por %p749_p5, %p748_p4 }
   0xf   :  { %p751_p7 = pnand %p750_p6, %p744_p3 }
  0x11   :  { %754 = shalt.err (!%p751_p7)
}
  0x12   :  { %s852_s19 = smov 128   ;;  %s853_s20 = smov 8  }
  0x13   :  { %39 = dma.hbm_to_vmem [thread:$0]  %s989_s1, 2048, %s34_s10, [#allocation6], %s852_s19, %s852_s19, %s853_s20  }
  0x14   :  { %s854_s23 = smov [#allocation2]   ;;  %s855_s25 = smov [#allocation7]  }
  0x15   :  { %s24_s24 = sshll.u32 %s854_s23, 4  ;;  %s47_s26 = sshll.u32 %s855_s25, 4  ;;  %s25_s24 = int_to_ptr.vmem [resolvable:$true] %s24_s24  ;;  %s48_s26 = int_to_ptr.vmem [resolvable:$true] %s47_s26 }
  0x16   :  { %s755_s29 = scalar_lea.hbm %s988_s0, 64 }
  0x17   :  { %p756_p8 = scmp.ne.s32.totalorder %s988_s0, %s755_s29  ;;  %p759_p9 = scmp.lt.u32.totalorder %s755_s29, %s988_s0 }
  0x19   :  { %p761_p10 = pnand %p759_p9, %p756_p8 }
  0x1b   :  { %764 = shalt.err (!%p761_p10)
}
  0x1c   :  { %s765_s1 = scalar_lea.vmem %s25_s24, 64  ;;  %p770_p12 = scmp.lt.s32.totalorder %s25_s24, %s25_s24 }
  0x1d   :  { %p766_p11 = scmp.ne.s32.totalorder %s25_s24, %s765_s1  ;;  %p771_p13 = scmp.lt.s32.totalorder %s765_s1, %s765_s1 }
  0x1f   :  { %p772_p0 = por %p771_p13, %p770_p12 }
  0x21   :  { %p773_p1 = pnand %p772_p0, %p766_p11 }
  0x23   :  { %776 = shalt.err (!%p773_p1)
}
  0x24   :  { %27 = dma.hbm_to_vmem [thread:$0]  %s988_s0, 64, %s25_s24, [#allocation3]  }
  0x25   :  { %s777_s17 = scalar_lea.hbm %s991_s3, 2048 }
  0x26   :  { %p778_p2 = scmp.ne.s32.totalorder %s991_s3, %s777_s17  ;;  %p781_p3 = scmp.lt.u32.totalorder %s777_s17, %s991_s3 }
  0x28   :  { %p783_p4 = pnand %p781_p3, %p778_p2 }
  0x2a   :  { %786 = shalt.err (!%p783_p4)
}
  0x2b   :  { %s787_s22 = scalar_lea.vmem %s48_s26, 2048  ;;  %p792_p6 = scmp.lt.s32.totalorder %s48_s26, %s48_s26 }
  0x2c   :  { %p788_p5 = scmp.ne.s32.totalorder %s48_s26, %s787_s22  ;;  %p793_p7 = scmp.lt.s32.totalorder %s787_s22, %s787_s22 }
  0x2e   :  { %p794_p8 = por %p793_p7, %p792_p6 }
  0x30   :  { %p795_p9 = pnand %p794_p8, %p788_p5 }
  0x32   :  { %798 = shalt.err (!%p795_p9)
}
  0x33   :  { %s856_s0 = smov 64   ;;  %s857_s23 = smov 4  }
  0x34   :  { %53 = dma.hbm_to_vmem [thread:$0]  %s991_s3, 2048, %s48_s26, [#allocation6], %s856_s0, %s856_s0, %s857_s23  }
  0x35   :  { %s858_s27 = smov [#allocation8]   ;;  %s799_s11 = scalar_lea.hbm %s993_s5, 1024 }
  0x36   :  { %s61_s28 = sshll.u32 %s858_s27, 4  ;;  %p800_p10 = scmp.ne.s32.totalorder %s993_s5, %s799_s11  ;;  %s62_s28 = int_to_ptr.vmem [resolvable:$true] %s61_s28 }
  0x37   :  { %p803_p11 = scmp.lt.u32.totalorder %s799_s11, %s993_s5 }
  0x39   :  { %p805_p12 = pnand %p803_p11, %p800_p10 }
  0x3b   :  { %808 = shalt.err (!%p805_p12)
}
  0x3c   :  { %s809_s14 = scalar_lea.vmem %s62_s28, 1024  ;;  %p814_p0 = scmp.lt.s32.totalorder %s62_s28, %s62_s28 }
  0x3d   :  { %p810_p13 = scmp.ne.s32.totalorder %s62_s28, %s809_s14  ;;  %p815_p1 = scmp.lt.s32.totalorder %s809_s14, %s809_s14 }
  0x3f   :  { %p816_p2 = por %p815_p1, %p814_p0 }
  0x41   :  { %p817_p3 = pnand %p816_p2, %p810_p13 }
  0x43   :  { %820 = shalt.err (!%p817_p3)
}
  0x44   :  { %67 = dma.hbm_to_vmem [thread:$0]  %s993_s5, 1024, %s62_s28, [#allocation9], %s856_s0, %s856_s0, %s857_s23  }
  0x45   :  { %843 = dma.done.wait [#allocation3], 64  }
  0x46   :  { %844 = vsyncadd [#allocation3], 4294967232 }
  0x47   :  { %845 = dma.done.wait [#allocation6], 4096  }
  0x48   :  { %846 = vsyncadd [#allocation6], 4294963200 }
  0x49   :  { %847 = dma.done.wait [#allocation9], 1024  }
  0x4a   :  { %848 = vsyncadd [#allocation9], 4294966272  ;;  %v859_v0 = vmov 0   ;;  %v681_v1 = vld [vmem:[#allocation5 + $0x4] ss:$8 sps:$4 sm:$0xff]   ;;  %v709_v15 = vld [vmem:[#allocation7 + $0x50] sm:$0xff]   ;;  %v106_v41 = vlaneseq }
  0x4b   :  { %228 = vmatprep.mubr.bf16.mxu0 %v859_v0  ;;  %v683_v2 = vld [vmem:[#allocation5] ss:$8 sps:$4 sm:$0xff]   ;;  %196 = vmatprep.subr.bf16.mxu0 %v681_v1  ;;  %v684_v3 = vld [vmem:[#allocation5 + $0x14] ss:$8 sps:$4 sm:$0xff]   ;;  %v686_v4 = vld [vmem:[#allocation5 + $0x10] ss:$8 sps:$4 sm:$0xff]  }
  0x4c   :  { %197 = vmatpush1.bf16.msra.mxu0 %v683_v2  ;;  %v687_v5 = vld [vmem:[#allocation5 + $0x24] ss:$8 sps:$4 sm:$0xff]   ;;  %v689_v6 = vld [vmem:[#allocation5 + $0x20] ss:$8 sps:$4 sm:$0xff]   ;;  %v690_v7 = vld [vmem:[#allocation5 + $0x34] ss:$8 sps:$4 sm:$0xff]  }
  0x4d   :  { %198 = vmatprep.subr.bf16.mxu0 %v684_v3  ;;  %v692_v8 = vld [vmem:[#allocation5 + $0x30] ss:$8 sps:$4 sm:$0xff]   ;;  %v693_v9 = vld [vmem:[#allocation5 + $0x44] ss:$8 sps:$4 sm:$0xff]   ;;  %v695_v12 = vld [vmem:[#allocation5 + $0x40] ss:$8 sps:$4 sm:$0xff]  }
  0x4e   :  { %v705_v10 = vld [vmem:[#allocation7 + $0x40] sm:$0xff]   ;;  %v707_v13 = vld [vmem:[#allocation7 + $0x48] sm:$0xff]   ;;  %v696_v16 = vld [vmem:[#allocation5 + $0x54] ss:$8 sps:$4 sm:$0xff]   ;;  %v860_v35 = vmov 0.0   ;;  %v107_v42 = vshrl.u32 %v106_v41, 7 }
  0x4f   :  { %v706_v11 = vld [vmem:[#allocation7] sm:$0xff]   ;;  %618 = vmatprep.subr.bf16.mxu1 %v705_v10  ;;  %v708_v14 = vld [vmem:[#allocation7 + $0x8] sm:$0xff]   ;;  %v698_v17 = vld [vmem:[#allocation5 + $0x50] ss:$8 sps:$4 sm:$0xff]   ;;  %vm861_vm0 = vmmov 0  }
  0x50   :  { %199 = vmatpush1.bf16.msra.mxu0 %v686_v4  ;;  %619 = vmatpush3.bf16.msra.mxu1 %v706_v11  ;;  %v710_v18 = vld [vmem:[#allocation7 + $0x10] sm:$0xff]   ;;  %v711_v19 = vld [vmem:[#allocation7 + $0x58] sm:$0xff]   ;;  %v699_v20 = vld [vmem:[#allocation5 + $0x64] ss:$8 sps:$4 sm:$0xff]   ;;  %v108_v43 = vsub.s32 0, %v107_v42  ;;  %v112_v45 = vsub.s32 1, %v107_v42 }
  0x51   :  { %200 = vmatprep.subr.bf16.mxu0 %v687_v5  ;;  %620 = vmatprep.subr.bf16.mxu1 %v707_v13  ;;  %v701_v21 = vld [vmem:[#allocation5 + $0x60] ss:$8 sps:$4 sm:$0xff]   ;;  %v702_v22 = vld [vmem:[#allocation5 + $0x74] ss:$8 sps:$4 sm:$0xff]   ;;  %v704_v26 = vld [vmem:[#allocation5 + $0x70] ss:$8 sps:$4 sm:$0xff]  }
  0x52   :  { %v712_v23 = vld [vmem:[#allocation7 + $0x18] sm:$0xff]   ;;  %v713_v24 = vld [vmem:[#allocation7 + $0x60] sm:$0xff]   ;;  %v715_v27 = vld [vmem:[#allocation7 + $0x68] sm:$0xff]  }
  0x53   :  { %v714_v25 = vld [vmem:[#allocation7 + $0x20] sm:$0xff]   ;;  %v716_v28 = vld [vmem:[#allocation7 + $0x28] sm:$0xff]   ;;  %v87_v29 = vld [vmem:[#allocation2] sm:$0xf] }
  0x54   :  { %201 = vmatpush1.bf16.msra.mxu0 %v689_v6  ;;  %621 = vmatpush3.bf16.msra.mxu1 %v708_v14  ;;  %v717_v30 = vld [vmem:[#allocation7 + $0x70] sm:$0xff]   ;;  %v719_v32 = vld [vmem:[#allocation7 + $0x78] sm:$0xff]   ;;  %v721_v34 = vld [vmem:[#allocation8] sm:$0xff]  }
  0x55   :  { %202 = vmatprep.subr.bf16.mxu0 %v690_v7  ;;  %622 = vmatprep.subr.bf16.mxu1 %v709_v15  ;;  %v718_v31 = vld [vmem:[#allocation7 + $0x30] sm:$0xff]   ;;  %v720_v33 = vld [vmem:[#allocation7 + $0x38] sm:$0xff]   ;;  %v722_v36 = vld [vmem:[#allocation8 + $0x8] sm:$0xff]  }
  0x56   :  { %v723_v37 = vld [vmem:[#allocation8 + $0x10] sm:$0xff]   ;;  %v724_v38 = vld [vmem:[#allocation8 + $0x18] sm:$0xff]   ;;  %v725_v39 = vld [vmem:[#allocation8 + $0x20] sm:$0xff]  }
  0x57   :  { %v726_v40 = vld [vmem:[#allocation8 + $0x28] sm:$0xff]   ;;  %v104_v44 = vld [vmem:[%s990_s2] sm:$0x3]  ;;  %v727_v58 = vld [vmem:[#allocation8 + $0x30] sm:$0xff]  }
  0x58   :  { %203 = vmatpush1.bf16.msra.mxu0 %v692_v8  ;;  %623 = vmatpush3.bf16.msra.mxu1 %v710_v18  ;;  %v109_v46 = vrot.slane %v104_v44, %v108_v43  ;;  %v113_v47 = vrot.slane %v104_v44, %v112_v45  ;;  %v728_v59 = vld [vmem:[#allocation8 + $0x38] sm:$0xff]  }
  0x59   :  { %204 = vmatprep.subr.bf16.mxu0 %v693_v9  ;;  %624 = vmatprep.subr.bf16.mxu1 %v711_v19  ;;  %v590_v61 = vld [vmem:[%s992_s4] ss:$0 sm:$0xff] }
  0x5a   :  { %v607_v5 = vld [vmem:[%s994_s6] ss:$0 sm:$0xff]  ;;  %s862_s6 = smov [#allocation10]  }
  0x5b   :  { %v616_v9 = vld [vmem:[%s995_s7] ss:$0 sm:$0xff]  ;;  %s563_s7 = sshll.u32 %s862_s6, 4  ;;  %s564_s7 = int_to_ptr.vmem [resolvable:$true] %s563_s7 }
  0x5c   :  { %205 = vmatpush1.bf16.msra.mxu0 %v695_v12  ;;  %625 = vmatpush3.bf16.msra.mxu1 %v712_v23  ;;  %v617_v13 = vld [vmem:[%s996_s8] ss:$0 sm:$0xff]  ;;  %s821_s22 = scalar_lea.vmem %s564_s7, 64  ;;  %p826_p5 = scmp.lt.s32.totalorder %s564_s7, %s564_s7 }
  0x5d   :  { %206 = vmatprep.subr.bf16.mxu0 %v696_v16  ;;  %626 = vmatprep.subr.bf16.mxu1 %v713_v24  ;;  %p822_p4 = scmp.ne.s32.totalorder %s564_s7, %s821_s22  ;;  %p827_p6 = scmp.lt.s32.totalorder %s821_s22, %s821_s22 }
  0x5f   :  { %p828_p7 = por %p827_p6, %p826_p5 }
  0x60   :  { %207 = vmatpush1.bf16.msra.mxu0 %v698_v17  ;;  %627 = vmatpush3.bf16.msra.mxu1 %v714_v25 }
  0x61   :  { %208 = vmatprep.subr.bf16.mxu0 %v699_v20  ;;  %628 = vmatprep.subr.bf16.mxu1 %v715_v27  ;;  %p829_p8 = pnand %p828_p7, %p822_p4 }
  0x64   :  { %209 = vmatpush1.bf16.msra.mxu0 %v701_v21  ;;  %629 = vmatpush3.bf16.msra.mxu1 %v716_v28 }
  0x65   :  { %210 = vmatprep.subr.bf16.mxu0 %v702_v22  ;;  %630 = vmatprep.subr.bf16.mxu1 %v717_v30 }
  0x68   :  { %211 = vmatpush1.bf16.msra.mxu0 %v704_v26  ;;  %631 = vmatpush3.bf16.msra.mxu1 %v718_v31 }
  0x69   :  { %632 = vmatprep.subr.bf16.mxu1 %v719_v32  ;;  %649 = vmatprep.subr.bf16.mxu0 %v860_v35 }
  0x6b   :  { %229 = vmatmul.mubr.bf16.vlgmr.msra.gmra.mrb[0].mxu0 %v87_v29 }
  0x6c   :  { %633 = vmatpush3.bf16.msra.mxu1 %v720_v33  ;;  %650 = vmatpush3.bf16.msra.mxu0 %v721_v34 }
  0x6d   :  { %651 = vmatprep.subr.bf16.mxu0 %v860_v35  ;;  %665 = vmatprep.mubr.msk.bf16.mxu0 %vm861_vm0, %v860_v35 }
  0x70   :  { %652 = vmatpush3.bf16.msra.mxu0 %v722_v36 }
  0x71   :  { %653 = vmatprep.subr.bf16.mxu0 %v860_v35 }
  0x74   :  { %654 = vmatpush3.bf16.msra.mxu0 %v723_v37 }
  0x75   :  { %655 = vmatprep.subr.bf16.mxu0 %v860_v35 }
  0x78   :  { %656 = vmatpush3.bf16.msra.mxu0 %v724_v38 }
  0x79   :  { %657 = vmatprep.subr.bf16.mxu0 %v860_v35 }
  0x7c   :  { %658 = vmatpush3.bf16.msra.mxu0 %v725_v39 }
  0x7d   :  { %659 = vmatprep.subr.bf16.mxu0 %v860_v35 }
  0x80   :  { %660 = vmatpush3.bf16.msra.mxu0 %v726_v40 }
  0x81   :  { %661 = vmatprep.subr.bf16.mxu0 %v860_v35 }
  0x84   :  { %662 = vmatpush3.bf16.msra.mxu0 %v727_v58 }
  0x85   :  { %663 = vmatprep.subr.bf16.mxu0 %v860_v35 }
  0x88   :  { %664 = vmatpush3.bf16.msra.mxu0 %v728_v59 }
 0x13e   :  { %v230_v48 = vpop.f32.mrb[0].mxu0 }
 0x13f   :  { %v231_v49 = vadd.f32 %v230_v48, %v109_v46  ;;  %v232_v50 = vpop.f32.mrb[1].mxu0 }
 0x140   :  { %v233_v51 = vadd.f32 %v232_v50, %v113_v47  ;;  %v234_v52 = vpop.f32.mrb[2].mxu0 }
 0x141   :  { %v237_v53 = vmax.f32 %v231_v49, 0.0  ;;  %v235_v54 = vpop.f32.mrb[3].mxu0 }
 0x142   :  { %v238_v55 = vmax.f32 %v233_v51, 0.0 }
 0x143   :  { %v239_v57 = vpack.c.bf16 %v237_v53, %v237_v53 }
 0x144   :  { %v240_v56 = vpack.c.bf16 %v238_v55, %v238_v55 }
 0x146   :  { %408 = vmatprep.mubr.bf16.mxu1 %v240_v56 }
 0x147   :  { %409 = vmatmul.mubr.bf16.vlgmr.msra.gmra.mrb[0].mxu1 %v239_v57 }
 0x21a   :  { %v634_v60 = vpop.f32.mrb[0].mxu1 }
 0x21b   :  { %v635_v62 = vpop.f32.mrb[1].mxu1 }
 0x21c   :  { %v636_v63 = vadd.f32 %v635_v62, %v634_v60  ;;  %v637_v0 = vpop.f32.mrb[2].mxu1 }
 0x21d   :  { %v638_v1 = vpop.f32.mrb[3].mxu1 }
 0x21e   :  { %v411_v2 = vadd.f32 %v636_v63, %v590_v61 }
 0x220   :  { %v416_v3 = vmax.f32 %v411_v2, 0.0 }
 0x222   :  { %v417_v4 = vpack.c.bf16 %v416_v3, %v416_v3 }
 0x224   :  { %666 = vmatmul.mubr.bf16.vlgmr.msra.gmra.mrb[4].mxu0 %v417_v4 }
 0x2f7   :  { %v523_v6 = vpop.f32.mrb[4].mxu0 }
 0x2f8   :  { %v524_v7 = vadd.f32 %v607_v5, %v523_v6  ;;  %v667_v8 = vpop.f32.mrb[5].mxu0 }
 0x2f9   :  { %v526_v10 = vpop.f32.mrb[6].mxu0 }
 0x2fa   :  { %v529_v11 = vmax.f32 %v524_v7, 0.0  ;;  %v668_v12 = vpop.f32.mrb[7].mxu0 }
 0x2fc   :  { %v537_v14 = vmul.f32 %v616_v9, %v529_v11 }
 0x2fe   :  { %v545_v15 = vadd.f32 %v617_v13, %v537_v14 }
 0x300   :  { %546 = vmax.xlane.f32.xlu0 %v545_v15 }
 0x38d   :  { %v547_v16 = vpop.xlane.xlu0 %546 }
 0x38e   :  { %v548_v17 = vsub.f32 %v545_v15, %v547_v16 }
 0x390   :  { %v549_v18 = vmul.f32 1.442695, %v548_v17 }
 0x392   :  { %729 = vpow2.f32 %v549_v18 }
 0x39c   :  { %v730_v19 = vpop.eup %729 }
 0x39d   :  { %551 = vadd.xlane.f32.xlu0 %v730_v19 }
 0x42a   :  { %v552_v20 = vpop.xlane.xlu0 %551 }
 0x42b   :  { %731 = vrcp.f32 %v552_v20 }
 0x435   :  { %v732_v21 = vpop.eup %731 }
 0x436   :  { %v554_v22 = vmul.f32 %v732_v21, %v730_v19 }
 0x438   :  { %v555_v23 = vpack.c.bf16 %v554_v22, %v554_v22 }
 0x43a   :  { %556 = vst [vmem:[#allocation10] sm:$0xf] %v555_v23 }
 0x43b   :  { %832 = shalt.err (!%p829_p8)
}
 0x43c   :  { %s833_s23 = scalar_lea.hbm %s997_s9, 64 }
 0x43d   :  { %p834_p9 = scmp.ne.s32.totalorder %s997_s9, %s833_s23  ;;  %p837_p10 = scmp.lt.u32.totalorder %s833_s23, %s997_s9 }
 0x43f   :  { %p839_p11 = pnand %p837_p10, %p834_p9 }
 0x441   :  { %842 = shalt.err (!%p839_p11)
}
 0x442   :  { %566 = dma.vmem_to_hbm [thread:$0]  %s564_s7, 64, %s997_s9, [#allocation4]  }
 0x443   :  { %849 = dma.done.wait [#allocation4], 64  }
 0x444   :  { %850 = vsyncadd [#allocation4], 4294967232 }
 0x445   :  { %570 = vsyncpa [#allocation3], 1 }
 0x446   :  { %571 = vsyncpa [#allocation6], 1 }
 0x447   :  { %572 = vsyncpa [#allocation9], 1 }
 0x448   :  { %573 = vsyncpa [#allocation4], 1 }

</bundles_post_ra>
